<compile_context>
chip_gen: v7x
topology: tpu7x:2x2x1
jax: 0.10.0
libtpu: 0.0.40
codegen_flags: <defaults>
</compile_context>

<pallas_src>
import jax
import jax.numpy as jnp
from jax.experimental import pallas as pl
from jax.experimental.pallas import tpu as pltpu

BLOCK2SIZE = {'block1': 64, 'block2': 192, 'block3': 480, 'block4': 832, 'block5': 1024}

_VMEM_LIMIT = 32 * 1024 * 1024          # safe scoped-VMEM cap on v5e/v6e/v7x


# ----------------------------------------------------------------------------- helpers
def _round_up(x, m):
    return ((x + m - 1) // m) * m


def _triple(v):
    return (v, v, v) if isinstance(v, int) else tuple(v)


# ---------------------------------------------------- Pallas kernel #1: matmul + BN + ReLU
def _mm_bn_relu_kernel(a_ref, w_ref, s_ref, b_ref, o_ref):
    # a: (tm, K) bf16   w: (K, tn) bf16   s/b: (1, tn) f32   o: (tm, tn) bf16
    y = jnp.dot(a_ref[...], w_ref[...], preferred_element_type=jnp.float32)
    y = y * s_ref[...] + b_ref[...]
    o_ref[...] = jnp.maximum(y, 0.0).astype(o_ref.dtype)


def fused_matmul_bn_relu(a, w, scale, bias, tn=None):
    """relu((a @ w) * scale + bias) -> bf16.  a:[M,K] bf16, w:[K,N] bf16, scale/bias:[N] f32."""
    M, K = a.shape
    N = w.shape[1]
    tm = min(512, _round_up(M, 8))
    Mp = _round_up(M, tm)
    if Mp != M:
        a = jnp.pad(a, ((0, Mp - M), (0, 0)))
    if tn is None:
        tn = N
    assert N % tn == 0
    out = pl.pallas_call(
        _mm_bn_relu_kernel,
        out_shape=jax.ShapeDtypeStruct((Mp, N), jnp.bfloat16),
        grid=(Mp // tm, N // tn),
        in_specs=[
            pl.BlockSpec((tm, K), lambda i, j: (i, 0)),
            pl.BlockSpec((K, tn), lambda i, j: (0, j)),
            pl.BlockSpec((1, tn), lambda i, j: (0, j)),
            pl.BlockSpec((1, tn), lambda i, j: (0, j)),
        ],
        out_specs=pl.BlockSpec((tm, tn), lambda i, j: (i, j)),
        compiler_params=pltpu.CompilerParams(
            dimension_semantics=("parallel", "parallel"),
            vmem_limit_bytes=_VMEM_LIMIT),
    )(a, w, scale.reshape(1, N), bias.reshape(1, N))
    return out[:M]


# --------------------------------- Pallas kernel #2: temporal conv (tap-accumulated matmul)
def _tap_matmul_kernel(a_ref, w_ref, s_ref, b_ref, o_ref, acc_ref):
    # a: (tm, C) bf16   w: (C, Cout) bf16   acc: (tm, Cout) f32   o: (tm, Cout) bf16
    dt = pl.program_id(3)

    @pl.when(dt == 0)
    def _init():
        acc_ref[...] = jnp.zeros_like(acc_ref)

    acc_ref[...] += jnp.dot(a_ref[...], w_ref[...],
                            preferred_element_type=jnp.float32)

    @pl.when(dt == pl.num_programs(3) - 1)
    def _finalize():
        y = acc_ref[...] * s_ref[...] + b_ref[...]
        o_ref[...] = jnp.maximum(y, 0.0).astype(o_ref.dtype)


def conv_temporal_bn_relu(x, w3, scale, bias, kt, st, pt):
    """(kt,1,1) conv + BN + ReLU with NO im2col: grid reduction axis over the kt taps.

    x: [N,T,H,W,C] bf16    w3: [kt, C, Cout] bf16    scale/bias: [Cout] f32
    """
    N, T, H, W, C = x.shape
    Cout = w3.shape[2]
    Tp = T + 2 * pt
    To = (Tp - kt) // st + 1
    xp = jnp.pad(x, ((0, 0), (pt, pt), (0, 0), (0, 0), (0, 0))) if pt else x
    M = H * W
    xr = xp.reshape(N, Tp, M, C)                       # layout-preserving merge of H,W
    tm = min(512, _round_up(M, 8))
    Mp = _round_up(M, tm)
    if Mp != M:
        xr = jnp.pad(xr, ((0, 0), (0, 0), (0, Mp - M), (0, 0)))

    out = pl.pallas_call(
        _tap_matmul_kernel,
        out_shape=jax.ShapeDtypeStruct((N, To, Mp, Cout), jnp.bfloat16),
        grid=(N, To, Mp // tm, kt),
        in_specs=[
            pl.BlockSpec((None, None, tm, C),
                         lambda n, t, j, dt: (n, t * st + dt, j, 0)),
            pl.BlockSpec((None, C, Cout), lambda n, t, j, dt: (dt, 0, 0)),
            pl.BlockSpec((1, Cout), lambda n, t, j, dt: (0, 0)),
            pl.BlockSpec((1, Cout), lambda n, t, j, dt: (0, 0)),
        ],
        out_specs=pl.BlockSpec((None, None, tm, Cout),
                               lambda n, t, j, dt: (n, t, j, 0)),
        scratch_shapes=[pltpu.VMEM((tm, Cout), jnp.float32)],
        compiler_params=pltpu.CompilerParams(
            dimension_semantics=("parallel", "parallel", "parallel", "arbitrary"),
            vmem_limit_bytes=_VMEM_LIMIT),
    )(xr, w3, scale.reshape(1, Cout), bias.reshape(1, Cout))

    return out[:, :, :M, :].reshape(N, To, H, W, Cout)


# --------------------------------------- Pallas kernel #3: 1-D max pool (separable pooling)
def _make_pool1d_kernel(k, L1):
    def kernel(x_ref, o_ref):
        # x: (tr, Lp, D)  ->  o: (tr, L1, D)   stride-1 window max via shifted slices (VPU)
        r = x_ref[:, 0:L1, :]
        for d in range(1, k):
            r = jnp.maximum(r, x_ref[:, d:d + L1, :])
        o_ref[...] = r
    return kernel


def _pool1d(x, axis, k, s, p):
    """1-D max pool along `axis` of an N-D array (window k, stride s, pad p with -inf)."""
    if k == 1 and s == 1 and p == 0:
        return x
    shape = x.shape
    L = shape[axis]
    R = 1
    for d in shape[:axis]:
        R *= d
    D = 1
    for d in shape[axis + 1:]:
        D *= d
    x3 = x.reshape(R, L, D)
    Lo = (L + 2 * p - k) // s + 1

    if k == 1:
        out3 = x3[:, ::s, :]
    else:
        Lp = L + 2 * p
        if p:
            x3 = jnp.pad(x3, ((0, 0), (p, p), (0, 0)), constant_values=-jnp.inf)
        L1 = Lp - k + 1
        row_bytes = Lp * D * x3.dtype.itemsize
        tr = max(1, min((4 * 1024 * 1024) // row_bytes, R))
        Rp = _round_up(R, tr)
        if Rp != R:
            x3 = jnp.pad(x3, ((0, Rp - R), (0, 0), (0, 0)))
        out3 = pl.pallas_call(
            _make_pool1d_kernel(k, L1),
            out_shape=jax.ShapeDtypeStruct((Rp, L1, D), x3.dtype),
            grid=(Rp // tr,),
            in_specs=[pl.BlockSpec((tr, Lp, D), lambda i: (i, 0, 0))],
            out_specs=pl.BlockSpec((tr, L1, D), lambda i: (i, 0, 0)),
            compiler_params=pltpu.CompilerParams(
                dimension_semantics=("parallel",),
                vmem_limit_bytes=_VMEM_LIMIT),
        )(x3)
        out3 = out3[:R]
        if s > 1:
            out3 = out3[:, ::s, :]          # stride-s pool == stride-1 pool subsampled

    return out3.reshape(shape[:axis] + (Lo,) + shape[axis + 1:])


def maxpool3d(x, kernel, stride, padding):
    """Separable 3-D max pool: three 1-D passes (T, H, W) -- no 27x patch expansion."""
    kt, kh, kw = kernel
    st, sh, sw = stride
    pt, ph, pw = padding
    x = _pool1d(x, 1, kt, st, pt)
    x = _pool1d(x, 2, kh, sh, ph)
    x = _pool1d(x, 3, kw, sw, pw)
    return x


# -------------------------------------------------------------- spatial conv (im2col glue)
def conv_spatial_bn_relu(x, w2, scale, bias, k, s, p):
    """(1,k,k) conv + BN + ReLU via bf16 im2col + fused Pallas matmul."""
    N, T, H, W, C = x.shape
    xp = jnp.pad(x, ((0, 0), (0, 0), (p, p), (p, p), (0, 0)))
    Ho = (H + 2 * p - k) // s + 1
    Wo = (W + 2 * p - k) // s + 1
    taps = []
    for dh in range(k):
        for dw in range(k):
            taps.append(xp[:, :, dh:dh + (Ho - 1) * s + 1:s,
                              dw:dw + (Wo - 1) * s + 1:s, :])
    a = jnp.stack(taps, axis=-2).reshape(N * T * Ho * Wo, k * k * C)
    Cout = w2.shape[1]
    out = fused_matmul_bn_relu(a, w2, scale, bias)
    return out.reshape(N, T, Ho, Wo, Cout)


# -------------------------------------------------------------- deterministic parameters
class _ParamGen:
    def __init__(self, seed=0):
        self._key = jax.random.PRNGKey(seed)

    def _next(self):
        self._key, sub = jax.random.split(self._key)
        return sub

    def conv_weight(self, kt, kh, kw, cin, cout):
        fan_in = kt * kh * kw * cin
        w = jax.random.normal(self._next(), (kt, kh, kw, cin, cout), dtype=jnp.float32)
        return w * jnp.sqrt(2.0 / fan_in)

    def bn(self, c, eps=1e-3):
        gamma = jax.random.uniform(self._next(), (c,), minval=0.75, maxval=1.25,
                                   dtype=jnp.float32)
        beta = 0.1 * jax.random.normal(self._next(), (c,), dtype=jnp.float32)
        running_mean = jnp.zeros((c,), jnp.float32)
        running_var = jnp.ones((c,), jnp.float32)
        scale = gamma / jnp.sqrt(running_var + eps)
        bias = beta - running_mean * scale
        return scale, bias


# ------------------------------------------------------------------------ layer builders
def make_pointwise_conv(pg, cin, cout):
    w = pg.conv_weight(1, 1, 1, cin, cout).reshape(cin, cout).astype(jnp.bfloat16)
    scale, bias = pg.bn(cout)

    def apply(x):
        N, T, H, W, C = x.shape
        a = x.reshape(N * T * H * W, C)
        out = fused_matmul_bn_relu(a, w, scale, bias)
        return out.reshape(N, T, H, W, cout)
    return apply


def make_spatial_conv(pg, cin, cout, k, s, p):
    w = pg.conv_weight(1, k, k, cin, cout).reshape(k * k * cin, cout).astype(jnp.bfloat16)
    scale, bias = pg.bn(cout)

    def apply(x):
        return conv_spatial_bn_relu(x, w, scale, bias, k, s, p)
    return apply


def make_temporal_conv(pg, cin, cout, k, s, p):
    w = pg.conv_weight(k, 1, 1, cin, cout).reshape(k, cin, cout).astype(jnp.bfloat16)
    scale, bias = pg.bn(cout)

    def apply(x):
        return conv_temporal_bn_relu(x, w, scale, bias, k, s, p)
    return apply


def make_basic_conv3d(pg, cin, cout, kernel_size, stride, padding=0):
    k, s, p = _triple(kernel_size), _triple(stride), _triple(padding)
    if k == (1, 1, 1) and s == (1, 1, 1):
        return make_pointwise_conv(pg, cin, cout)
    if k[0] == 1 and s[0] == 1 and p[0] == 0:
        return make_spatial_conv(pg, cin, cout, k[1], s[1], p[1])
    if k[1] == 1 and k[2] == 1 and s[1] == 1 and s[2] == 1 and p[1] == 0 and p[2] == 0:
        return make_temporal_conv(pg, cin, cout, k[0], s[0], p[0])
    raise NotImplementedError(f"unsupported conv geometry {k}/{s}/{p}")


def make_sep_conv3d(pg, cin, cout, kernel_size, stride, padding=0):
    k, s, p = kernel_size, stride, padding
    conv_s = make_basic_conv3d(pg, cin, cout, (1, k, k), (1, s, s), (0, p, p))
    conv_t = make_basic_conv3d(pg, cout, cout, (k, 1, 1), (s, 1, 1), (p, 0, 0))

    def apply(x):
        return conv_t(conv_s(x))
    return apply


def make_maxpool3d(kernel_size, stride, padding):
    k, s, p = _triple(kernel_size), _triple(stride), _triple(padding)

    def apply(x):
        return maxpool3d(x, k, s, p)
    return apply


def make_fused_pointwise(pg, cin, couts):
    """Fuse several 1x1x1 conv+BN+ReLU branches (same input) into one lane-dense matmul."""
    ws, ss, bs = [], [], []
    for c in couts:
        ws.append(pg.conv_weight(1, 1, 1, cin, c).reshape(cin, c))
        s, b = pg.bn(c)
        ss.append(s)
        bs.append(b)
    w = jnp.concatenate(ws, axis=1)
    scale = jnp.concatenate(ss)
    bias = jnp.concatenate(bs)
    n = sum(couts)
    npad = _round_up(n, 128)                 # lane-dense stores + Cout grid axis (megacore)
    if npad != n:
        w = jnp.pad(w, ((0, 0), (0, npad - n)))
        scale = jnp.pad(scale, (0, npad - n))
        bias = jnp.pad(bias, (0, npad - n))
    w = w.astype(jnp.bfloat16)
    tn = 128 if npad > 128 else npad
    offs, o = [], 0
    for c in couts:
        offs.append((o, o + c))
        o += c

    def apply(x):
        N, T, H, W, C = x.shape
        a = x.reshape(N * T * H * W, C)
        out = fused_matmul_bn_relu(a, w, scale, bias, tn=tn)
        out = out.reshape(N, T, H, W, npad)
        return [out[..., lo:hi] for lo, hi in offs]
    return apply


# (in_ch, branch0, (branch1a, branch1b), (branch2a, branch2b), branch3)
_MIXED_CFG = {
    '3b': (192, 64, (96, 128), (16, 32), 32),
    '3c': (256, 128, (128, 192), (32, 96), 64),
    '4b': (480, 192, (96, 208), (16, 48), 64),
    '4c': (512, 160, (112, 224), (24, 64), 64),
    '4d': (512, 128, (128, 256), (24, 64), 64),
    '4e': (512, 112, (144, 288), (32, 64), 64),
    '4f': (528, 256, (160, 320), (32, 128), 128),
    '5b': (832, 256, (160, 320), (32, 128), 128),
    '5c': (832, 384, (192, 384), (48, 128), 128),
}


def make_mixed(pg, name):
    cin, b0, (b1a, b1b), (b2a, b2b), b3 = _MIXED_CFG[name]
    fused_pw = make_fused_pointwise(pg, cin, (b0, b1a, b2a))   # branch0 / branch1a / branch2a
    branch1_b = make_sep_conv3d(pg, b1a, b1b, 3, 1, 1)
    branch2_b = make_sep_conv3d(pg, b2a, b2b, 3, 1, 1)
    branch3_pool = make_maxpool3d((3, 3, 3), (1, 1, 1), (1, 1, 1))
    branch3_conv = make_basic_conv3d(pg, cin, b3, 1, 1, 0)

    def apply(x):
        y0, y1a, y2a = fused_pw(x)
        y1 = branch1_b(y1a)
        y2 = branch2_b(y2a)
        y3 = branch3_conv(branch3_pool(x))
        return jnp.concatenate([y0, y1, y2, y3], axis=-1)   # channel axis (== torch dim 1)
    return apply


# ------------------------------------------------------------------------------ modules
class S3DBlockJax:
    def __init__(self, pg, in_channels=3, blocks=5):
        self.in_channels = in_channels
        self.base, self.base_num_layers = self._build(pg, blocks)

    def _build(self, pg, blocks):
        block1 = [make_sep_conv3d(pg, self.in_channels, 64, 7, 2, 3)]
        block2 = [make_maxpool3d((1, 3, 3), (1, 2, 2), (0, 1, 1)),
                  make_basic_conv3d(pg, 64, 64, 1, 1, 0),
                  make_sep_conv3d(pg, 64, 192, 3, 1, 1)]
        block3 = [make_maxpool3d((1, 3, 3), (1, 2, 2), (0, 1, 1)),
                  make_mixed(pg, '3b'), make_mixed(pg, '3c')]
        block4 = [make_maxpool3d((3, 3, 3), (2, 2, 2), (1, 1, 1)),
                  make_mixed(pg, '4b'), make_mixed(pg, '4c'), make_mixed(pg, '4d'),
                  make_mixed(pg, '4e'), make_mixed(pg, '4f')]
        block5 = [make_maxpool3d((2, 2, 2), (2, 2, 2), (0, 0, 0)),
                  make_mixed(pg, '5b'), make_mixed(pg, '5c')]
        all_blocks = [block1, block2, block3, block4, block5]
        base = []
        for i in range(blocks):
            base += all_blocks[i]
        return base, len(base)


class S3DModuleJax:
    def __init__(self, in_channels, blocks=5, seed=0):
        pg = _ParamGen(seed)
        self.backbone = S3DBlockJax(pg, in_channels=in_channels, blocks=blocks)
        self.out_channels = BLOCK2SIZE[f'block{blocks}']
        self.stage_idx = [0, 3, 6, 12, 15][:blocks]
        self.blocks = blocks
        self.num_levels = 3

    def forward(self, videos):
        # videos: PyTorch layout [B, C, T, H, W] float32
        x = jnp.transpose(videos, (0, 2, 3, 4, 1)).astype(jnp.bfloat16)   # -> NTHWC bf16
        features = []
        n_hooks = len(self.stage_idx[self.blocks - self.num_levels:])
        for layer in self.backbone.base:
            x = layer(x)
            # One transpose+cast per layer; appended n_hooks times by reference, exactly
            # mirroring the reference module's inner loop (which ignores `stage`).
            feat = jnp.transpose(x, (0, 4, 1, 2, 3)).astype(jnp.float32)  # back to NCTHW
            for _ in range(n_hooks):
                features.append(feat)
        return {'sgn_feature': features[-1], 'fea_lst': features}


# --------------------------------------------------------------------------------- main
if __name__ == "__main__":
    key = jax.random.PRNGKey(0)
    B, C, T, H, W = 2, 3, 8, 32, 32
    videos = jax.random.normal(key, (B, C, T, H, W), dtype=jnp.float32)

    model = S3DModuleJax(in_channels=C, blocks=5, seed=0)
    out = model.forward(videos)

    sgn = jax.block_until_ready(out['sgn_feature'])
    assert sgn.shape == (B, model.out_channels, 1, 1, 1), sgn.shape
    assert sgn.dtype == jnp.float32
    n_stages = len(model.stage_idx[model.blocks - model.num_levels:])
    assert len(out['fea_lst']) == model.backbone.base_num_layers * n_stages
    assert bool(jnp.isfinite(sgn).all())
    print("KERNEL_OK")
</pallas_src>

<mosaic_0001>
module attributes {stable_mosaic.version = 11 : i64} {
  func.func @_mm_bn_relu_kernel(%arg0: i32, %arg1: i32, %arg2: memref<512x147xbf16, #tpu.memory_space<vmem>>, %arg3: memref<147x64xbf16, #tpu.memory_space<vmem>>, %arg4: memref<1x64xf32, #tpu.memory_space<vmem>>, %arg5: memref<1x64xf32, #tpu.memory_space<vmem>>, %arg6: memref<512x64xbf16, #tpu.memory_space<vmem>>) attributes {dimension_semantics = [#tpu.dimension_semantics<parallel>, #tpu.dimension_semantics<parallel>], iteration_bounds = array<i64: 8, 1>, scalar_prefetch = 0 : i64, scratch_operands = 0 : i64, tpu.core_type = #tpu.core_type<tc>, window_params = [{transform_indices = @transform_0, window_bounds = array<i64: 512, 147>}, {transform_indices = @transform_1, window_bounds = array<i64: 147, 64>}, {transform_indices = @transform_2, window_bounds = array<i64: 1, 64>}, {transform_indices = @transform_3, window_bounds = array<i64: 1, 64>}, {transform_indices = @transform_4, window_bounds = array<i64: 512, 64>}]} {
    %c0 = arith.constant 0 : index
    %c0_0 = arith.constant 0 : index
    %0 = vector.load %arg2[%c0, %c0_0] : memref<512x147xbf16, #tpu.memory_space<vmem>>, vector<512x147xbf16>
    %c0_1 = arith.constant 0 : index
    %c0_2 = arith.constant 0 : index
    %1 = vector.load %arg3[%c0_1, %c0_2] : memref<147x64xbf16, #tpu.memory_space<vmem>>, vector<147x64xbf16>
    %cst = arith.constant dense<0.000000e+00> : vector<512x64xf32>
    %2 = tpu.matmul %0, %1, %cst {dimension_numbers = #tpu.dot_dimension_numbers<[1], [0], [0], [1], [0, 0, 1, 1], [], []>} : vector<512x147xbf16>, vector<147x64xbf16>, vector<512x64xf32> -> vector<512x64xf32>
    %c0_3 = arith.constant 0 : index
    %c0_4 = arith.constant 0 : index
    %3 = vector.load %arg4[%c0_3, %c0_4] : memref<1x64xf32, #tpu.memory_space<vmem>>, vector<1x64xf32>
    %4 = vector.broadcast %3 : vector<1x64xf32> to vector<512x64xf32>
    %5 = arith.mulf %2, %4 : vector<512x64xf32>
    %c0_5 = arith.constant 0 : index
    %c0_6 = arith.constant 0 : index
    %6 = vector.load %arg5[%c0_5, %c0_6] : memref<1x64xf32, #tpu.memory_space<vmem>>, vector<1x64xf32>
    %7 = vector.broadcast %6 : vector<1x64xf32> to vector<512x64xf32>
    %8 = arith.addf %5, %7 : vector<512x64xf32>
    %cst_7 = arith.constant 0.000000e+00 : f32
    %9 = vector.broadcast %cst_7 : f32 to vector<512x64xf32>
    %10 = arith.maximumf %8, %9 : vector<512x64xf32>
    %11 = arith.truncf %10 : vector<512x64xf32> to vector<512x64xbf16>
    %c0_8 = arith.constant 0 : index
    %c0_9 = arith.constant 0 : index
    %12 = vector.load %arg6[%c0_8, %c0_9] : memref<512x64xbf16, #tpu.memory_space<vmem>>, vector<512x64xbf16>
    tpu.vector_store %arg6[%c0_8, %c0_9], %11 {strides = array<i32>} : memref<512x64xbf16, #tpu.memory_space<vmem>>, vector<512x64xbf16>,
    return
  }
  func.func @transform_0(%arg0: i32, %arg1: i32) -> (i32, i32) {
    %c0_i32 = arith.constant 0 : i32
    %c0_i32_0 = arith.constant 0 : i32
    return %arg0, %c0_i32 : i32, i32
  }
  func.func @transform_1(%arg0: i32, %arg1: i32) -> (i32, i32) {
    %c0_i32 = arith.constant 0 : i32
    %c0_i32_0 = arith.constant 0 : i32
    return %c0_i32, %arg1 : i32, i32
  }
  func.func @transform_2(%arg0: i32, %arg1: i32) -> (i32, i32) {
    %c0_i32 = arith.constant 0 : i32
    %c0_i32_0 = arith.constant 0 : i32
    return %c0_i32, %arg1 : i32, i32
  }
  func.func @transform_3(%arg0: i32, %arg1: i32) -> (i32, i32) {
    %c0_i32 = arith.constant 0 : i32
    %c0_i32_0 = arith.constant 0 : i32
    return %c0_i32, %arg1 : i32, i32
  }
  func.func @transform_4(%arg0: i32, %arg1: i32) -> (i32, i32) {
    %c0_i32 = arith.constant 0 : i32
    return %arg0, %arg1 : i32, i32
  }
}

</mosaic_0001>

<bundles_post_ra>
// kernel: tpu_custom_call.1
= control target key start
LH: loop header
LB: loop body
LE: loop exit
PB: predicated region body
PF: predicated region fallthrough
CT: control target
= control target key end

     0   :  { %s2187_s15 = smov 0   ;;  %s2189_s16 = smov 0   ;;  %s2620_s0 = inlined_call_operand.vmem [shape: bf16[4096,147], index: 0, kind: input, shape index: {}]   ;;  %s2621_s1 = inlined_call_operand.vmem [shape: bf16[147,64], index: 1, kind: input, shape index: {}]   ;;  %s2622_s2 = inlined_call_operand.vmem [shape: f32[1,64], index: 2, kind: input, shape index: {}]   ;;  %s2623_s3 = inlined_call_operand.vmem [shape: f32[1,64], index: 3, kind: input, shape index: {}]   ;;  %s2624_s4 = inlined_call_operand.vmem [shape: bf16[4096,64], index: 4, kind: output, shape index: {}]  }
   0x1   :  { %s2191_s17 = smov 0  }
   0x2 LB: > { %s26_s18 = sadd.s32 1, %s2154_s16  ;;  %p1739_p0 = scmp.ge.s32.totalorder %s2158_s17, 1  ;;  %s2158_s17 = sphi %s2191_s17, %s14_s17   ;;  %s2154_s16 = sphi %s2189_s16, %s2626_s16   ;;  %s2150_s15 = sphi %s2187_s15, %s2625_s15  }
   0x3   : > { %p28_p1 = scmp.ge.s32.totalorder %s26_s18, 8  ;;  %p203_p2 = scmp.lt.s32.totalorder %s2158_s17, 9 }
   0x5   : > { %s2628_s18 = smov (%p28_p1, %s26_s18), 0  ;;  %p204_p3 = pnand %p1739_p0, %p203_p2 }
   0x6   : > { %v2030_v0 = vld [vmem:[%s2621_s1] sm:$0xff] (!%p204_p3)   ;;  %v2160_v1 = vmov (!%p204_p3), 0   ;;  %v2031_v2 = vld [vmem:[%s2621_s1 + $0x8] sm:$0xff] (!%p204_p3)   ;;  %v2032_v3 = vld [vmem:[%s2621_s1 + $0x10] sm:$0xff] (!%p204_p3)   ;;  %s1740_s25 = sshll.u32 (!%p204_p3), %s2150_s15, 6  ;;  %vm698_vm0 = vcmask (!%p204_p3), 154624  }
   0x7   : > { %207 = sbr.rel (%p204_p3) target bundleno = 390 (0x186), region = 36  ;;  %802 = vmatprep.subr.bf16.mxu0 (!%p204_p3), %v2160_v1  ;;  %1984 = vmatprep.subr.bf16.mxu1 (!%p204_p3), %v2160_v1  ;;  %p244_p4 = scmp.lt.s32.totalorder (!%p204_p3), %s1740_s25, 511  ;;  %v2033_v4 = vld [vmem:[%s2621_s1 + $0x18] sm:$0xff] (!%p204_p3)   ;;  %v2034_v5 = vld [vmem:[%s2621_s1 + $0x20] sm:$0xff] (!%p204_p3)   ;;  %v2035_v8 = vld [vmem:[%s2621_s1 + $0x28] sm:$0xff] (!%p204_p3)   ;;  %vm795_vm1 = vcmask (!%p204_p3), 1040384  }
   0x8   : > { %803 = vmatpush1.bf16.msra.mxu0 (!%p204_p3), %v2030_v0  ;;  %1994 = vmatpush1.bf16.msra.mxu1 (!%p204_p3), %v2030_v0  ;;  %v2036_v9 = vld [vmem:[%s2621_s1 + $0x30] sm:$0xff] (!%p204_p3)   ;;  %v2037_v10 = vld [vmem:[%s2621_s1 + $0x38] sm:$0xff] (!%p204_p3)   ;;  %vm796_vm2 = vcmask (!%p204_p3), 1041408   ;;  %v2161_v11 = vmov (!%p204_p3), 65535   ;;  %v2038_v13 = vld [vmem:[%s2621_s1 + $0x40] sm:$0xff] (!%p204_p3)   ;;  %vm1553_vm3 = vcmask (!%p204_p3), 519168  }
   0x9   : > { %804 = vmatprep.subr.bf16.mxu0 (!%p204_p3), %v2160_v1  ;;  %1985 = vmatprep.subr.bf16.mxu1 (!%p204_p3), %v2160_v1  ;;  %v797_v12 = vsel (!%p204_p3), %vm795_vm1, 4294967295, %v2161_v11  ;;  %v2039_v14 = vld [vmem:[%s2621_s1 + $0x48] ss:$0 sps:$4 sm:$0x33] (!%p204_p3)  }
   0xa   : > { %v798_v15 = vsel (!%p204_p3), %vm796_vm2, %v797_v12, 0 }
   0xb   : > { %v800_v16 = vand.u32 (!%p204_p3), %v2039_v14, %v798_v15  ;;  %v2342_v15 = vld [vmem:[%s2622_s2] ss:$0 sm:$0xff] (!%p204_p3) }
   0xc   : > { %805 = vmatpush1.bf16.msra.mxu0 (!%p204_p3), %v2031_v2  ;;  %1995 = vmatpush1.bf16.msra.mxu1 (!%p204_p3), %v2031_v2 }
   0xd   : > { %806 = vmatprep.subr.bf16.mxu0 (!%p204_p3), %v2160_v1  ;;  %1986 = vmatprep.subr.bf16.mxu1 (!%p204_p3), %v2160_v1 }
   0xe   : > { %s2630_s25 = smov (!%p244_p4, %s1740_s25), 511 }
   0xf   : > { %s1919_s28 = sshll.u32 %s2630_s25, 3  ;;  %s1744_s26 = sshll.u32 %s2630_s25, 2 }
  0x10   : > { %807 = vmatpush1.bf16.msra.mxu0 %v2032_v3  ;;  %1996 = vmatpush1.bf16.msra.mxu1 %v2032_v3  ;;  %s2223_s5 = scalar_lea.vmem %s2620_s0, %s1919_s28  ;;  %s2361_s25 = scalar_lea.vmem %s2624_s4, %s1744_s26 }
  0x11   : > { %808 = vmatprep.subr.bf16.mxu0 %v2160_v1  ;;  %1987 = vmatprep.subr.bf16.mxu1 %v2160_v1  ;;  %v2042_v6 = vld [vmem:[%s2223_s5 + $0x4] ss:$8 sps:$4 sm:$0xff]   ;;  %v2040_v17 = vld [vmem:[%s2223_s5] ss:$8 sps:$4 sm:$0xff]   ;;  %v2046_v19 = vld [vmem:[%s2223_s5 + $0x14] ss:$8 sps:$4 sm:$0xff]  }
  0x12   : > { %v2045_v7 = vld [vmem:[%s2223_s5 + $0x104] ss:$8 sps:$4 sm:$0xff]   ;;  %1819 = vmatprep.mubr.msk.bf16.mxu0 %vm698_vm0, %v2042_v6  ;;  %v2043_v18 = vld [vmem:[%s2223_s5 + $0x100] ss:$8 sps:$4 sm:$0xff]   ;;  %v2048_v20 = vld [vmem:[%s2223_s5 + $0x114] ss:$8 sps:$4 sm:$0xff]  }
  0x13   : > { %1835 = vmatprep.mubr.msk.bf16.mxu1 %vm698_vm0, %v2045_v7  ;;  %v2050_v21 = vld [vmem:[%s2223_s5 + $0x10] ss:$8 sps:$4 sm:$0xff]   ;;  %v2052_v23 = vld [vmem:[%s2223_s5 + $0x24] ss:$8 sps:$4 sm:$0xff]   ;;  %v2056_v25 = vld [vmem:[%s2223_s5 + $0x20] ss:$8 sps:$4 sm:$0xff]  }
  0x14   : > { %809 = vmatpush1.bf16.msra.mxu0 %v2033_v4  ;;  %1997 = vmatpush1.bf16.msra.mxu1 %v2033_v4  ;;  %v2051_v22 = vld [vmem:[%s2223_s5 + $0x110] ss:$8 sps:$4 sm:$0xff]   ;;  %v2054_v24 = vld [vmem:[%s2223_s5 + $0x124] ss:$8 sps:$4 sm:$0xff]   ;;  %v2057_v26 = vld [vmem:[%s2223_s5 + $0x120] ss:$8 sps:$4 sm:$0xff]  }
  0x15   : > { %810 = vmatprep.subr.bf16.mxu0 %v2160_v1  ;;  %1988 = vmatprep.subr.bf16.mxu1 %v2160_v1  ;;  %v2058_v27 = vld [vmem:[%s2223_s5 + $0x34] ss:$8 sps:$4 sm:$0xff]   ;;  %v2062_v29 = vld [vmem:[%s2223_s5 + $0x30] ss:$8 sps:$4 sm:$0xff]   ;;  %v2064_v31 = vld [vmem:[%s2223_s5 + $0x44] ss:$8 sps:$4 sm:$0xff]  }
  0x16   : > { %v2060_v28 = vld [vmem:[%s2223_s5 + $0x134] ss:$8 sps:$4 sm:$0xff]   ;;  %v2063_v30 = vld [vmem:[%s2223_s5 + $0x130] ss:$8 sps:$4 sm:$0xff]   ;;  %v2066_v32 = vld [vmem:[%s2223_s5 + $0x144] ss:$8 sps:$4 sm:$0xff]  }
  0x17   : > { %v2068_v33 = vld [vmem:[%s2223_s5 + $0x40] ss:$8 sps:$4 sm:$0xff]   ;;  %v2070_v35 = vld [vmem:[%s2223_s5 + $0x54] ss:$8 sps:$4 sm:$0xff]   ;;  %v2074_v37 = vld [vmem:[%s2223_s5 + $0x50] ss:$8 sps:$4 sm:$0xff]  }
  0x18   : > { %811 = vmatpush1.bf16.msra.mxu0 %v2034_v5  ;;  %1998 = vmatpush1.bf16.msra.mxu1 %v2034_v5  ;;  %v2069_v34 = vld [vmem:[%s2223_s5 + $0x140] ss:$8 sps:$4 sm:$0xff]   ;;  %v2072_v36 = vld [vmem:[%s2223_s5 + $0x154] ss:$8 sps:$4 sm:$0xff]   ;;  %v2075_v38 = vld [vmem:[%s2223_s5 + $0x150] ss:$8 sps:$4 sm:$0xff]  }
  0x19   : > { %812 = vmatprep.subr.bf16.mxu0 %v2160_v1  ;;  %1989 = vmatprep.subr.bf16.mxu1 %v2160_v1  ;;  %v2076_v39 = vld [vmem:[%s2223_s5 + $0x64] ss:$8 sps:$4 sm:$0xff]   ;;  %v2080_v41 = vld [vmem:[%s2223_s5 + $0x60] ss:$8 sps:$4 sm:$0xff]   ;;  %v2082_v43 = vld [vmem:[%s2223_s5 + $0x74] ss:$8 sps:$4 sm:$0xff]  }
  0x1a   : > { %v2078_v40 = vld [vmem:[%s2223_s5 + $0x164] ss:$8 sps:$4 sm:$0xff]   ;;  %v2081_v42 = vld [vmem:[%s2223_s5 + $0x160] ss:$8 sps:$4 sm:$0xff]   ;;  %v2084_v44 = vld [vmem:[%s2223_s5 + $0x174] ss:$8 sps:$4 sm:$0xff]  }
  0x1b   : > { %v2086_v45 = vld [vmem:[%s2223_s5 + $0x70] ss:$8 sps:$4 sm:$0xff]   ;;  %v2088_v47 = vld [vmem:[%s2223_s5 + $0x84] ss:$8 sps:$4 sm:$0xff]   ;;  %v2092_v49 = vld [vmem:[%s2223_s5 + $0x80] ss:$8 sps:$4 sm:$0xff]  }
  0x1c   : > { %813 = vmatpush1.bf16.msra.mxu0 %v2035_v8  ;;  %1999 = vmatpush1.bf16.msra.mxu1 %v2035_v8  ;;  %v2087_v46 = vld [vmem:[%s2223_s5 + $0x170] ss:$8 sps:$4 sm:$0xff]   ;;  %v2090_v48 = vld [vmem:[%s2223_s5 + $0x184] ss:$8 sps:$4 sm:$0xff]   ;;  %v2093_v50 = vld [vmem:[%s2223_s5 + $0x180] ss:$8 sps:$4 sm:$0xff]  }
  0x1d   : > { %814 = vmatprep.subr.bf16.mxu0 %v2160_v1  ;;  %1990 = vmatprep.subr.bf16.mxu1 %v2160_v1  ;;  %v2094_v51 = vld [vmem:[%s2223_s5 + $0x94] ss:$8 sps:$4 sm:$0xff]   ;;  %v2098_v53 = vld [vmem:[%s2223_s5 + $0x90] ss:$8 sps:$4 sm:$0xff]   ;;  %v2100_v55 = vld [vmem:[%s2223_s5 + $0xa4] ss:$8 sps:$4 sm:$0xff]  }
  0x1e   : > { %v2096_v52 = vld [vmem:[%s2223_s5 + $0x194] ss:$8 sps:$4 sm:$0xff]   ;;  %v2099_v54 = vld [vmem:[%s2223_s5 + $0x190] ss:$8 sps:$4 sm:$0xff]   ;;  %v2102_v56 = vld [vmem:[%s2223_s5 + $0x1a4] ss:$8 sps:$4 sm:$0xff]  }
  0x1f   : > { %v2104_v57 = vld [vmem:[%s2223_s5 + $0xa0] ss:$8 sps:$4 sm:$0xff]   ;;  %v2106_v59 = vld [vmem:[%s2223_s5 + $0xb4] ss:$8 sps:$4 sm:$0xff]   ;;  %v2110_v61 = vld [vmem:[%s2223_s5 + $0xb0] ss:$8 sps:$4 sm:$0xff]  }
  0x20   : > { %815 = vmatpush1.bf16.msra.mxu0 %v2036_v9  ;;  %2000 = vmatpush1.bf16.msra.mxu1 %v2036_v9  ;;  %v2105_v58 = vld [vmem:[%s2223_s5 + $0x1a0] ss:$8 sps:$4 sm:$0xff]   ;;  %v2108_v60 = vld [vmem:[%s2223_s5 + $0x1b4] ss:$8 sps:$4 sm:$0xff]   ;;  %v2111_v62 = vld [vmem:[%s2223_s5 + $0x1b0] ss:$8 sps:$4 sm:$0xff]  }
  0x21   : > { %816 = vmatprep.subr.bf16.mxu0 %v2160_v1  ;;  %1991 = vmatprep.subr.bf16.mxu1 %v2160_v1  ;;  %v2112_v63 = vld [vmem:[%s2223_s5 + $0xc4] ss:$8 sps:$4 sm:$0xff]   ;;  %v2117_v2 = vld [vmem:[%s2223_s5 + $0x1c0] ss:$8 sps:$4 sm:$0xff]   ;;  %v2118_v3 = vld [vmem:[%s2223_s5 + $0xd4] ss:$8 sps:$4 sm:$0xff]  }
  0x22   : > { %v2114_v0 = vld [vmem:[%s2223_s5 + $0x1c4] ss:$8 sps:$4 sm:$0xff]   ;;  %v2120_v4 = vld [vmem:[%s2223_s5 + $0x1d4] ss:$8 sps:$4 sm:$0xff]   ;;  %v2122_v5 = vld [vmem:[%s2223_s5 + $0xd0] ss:$8 sps:$4 sm:$0xff]  }
  0x23   : > { %v2123_v6 = vld [vmem:[%s2223_s5 + $0x1d0] ss:$8 sps:$4 sm:$0xff]   ;;  %v2124_v7 = vld [vmem:[%s2223_s5 + $0xe4] ss:$8 sps:$4 sm:$0xff]   ;;  %v2128_v9 = vld [vmem:[%s2223_s5 + $0xe0] ss:$8 sps:$4 sm:$0xff]  }
  0x24   : > { %817 = vmatpush1.bf16.msra.mxu0 %v2037_v10  ;;  %2001 = vmatpush1.bf16.msra.mxu1 %v2037_v10  ;;  %v2126_v8 = vld [vmem:[%s2223_s5 + $0x1e4] ss:$8 sps:$4 sm:$0xff]   ;;  %v2129_v10 = vld [vmem:[%s2223_s5 + $0x1e0] ss:$8 sps:$4 sm:$0xff]   ;;  %v2130_v11 = vld [vmem:[%s2223_s5 + $0xf4] ss:$8 sps:$4 sm:$0xff]  }
  0x25   : > { %818 = vmatprep.subr.bf16.mxu0 %v2160_v1  ;;  %1992 = vmatprep.subr.bf16.mxu1 %v2160_v1  ;;  %v2132_v12 = vld [vmem:[%s2223_s5 + $0x1f4] ss:$8 sps:$4 sm:$0xff]   ;;  %v2135_v14 = vld [vmem:[%s2223_s5 + $0x1f0] ss:$8 sps:$4 sm:$0xff]  }
  0x28   : > { %819 = vmatpush1.bf16.msra.mxu0 %v2038_v13  ;;  %2002 = vmatpush1.bf16.msra.mxu1 %v2038_v13  ;;  %v2134_v13 = vld [vmem:[%s2223_s5 + $0xf0] ss:$8 sps:$4 sm:$0xff]  }
  0x29   : > { %820 = vmatprep.subr.bf16.mxu0 %v2160_v1  ;;  %1993 = vmatprep.subr.bf16.mxu1 %v2160_v1  ;;  %v2116_v1 = vld [vmem:[%s2223_s5 + $0xc0] ss:$8 sps:$4 sm:$0xff]  }
  0x2c   : > { %821 = vmatpush1.bf16.msra.mxu0 %v800_v16  ;;  %2003 = vmatpush1.bf16.msra.mxu1 %v800_v16 }
  0x2f   : > { %835 = vmatmul.mubr.bf16.vlgmr.msra.gmra.mrb[0].mxu0 %v2040_v17  ;;  %963 = vmatmul.mubr.bf16.vlgmr.msra.gmra.mrb[0].mxu1 %v2043_v18  ;;  %v2347_v17 = vld [vmem:[%s2623_s3] ss:$0 sm:$0xff] }
  0x30   : > { %1820 = vmatprep.mubr.msk.bf16.mxu0 %vm698_vm0, %v2046_v19  ;;  %1836 = vmatprep.mubr.msk.bf16.mxu1 %vm698_vm0, %v2048_v20 }
  0x37   : > { %843 = vmatmul.mubr.bf16.gmra.mrb[4].mxu0 %v2050_v21  ;;  %971 = vmatmul.mubr.bf16.gmra.mrb[4].mxu1 %v2051_v22 }
  0x38   : > { %1821 = vmatprep.mubr.msk.bf16.mxu0 %vm698_vm0, %v2052_v23  ;;  %1837 = vmatprep.mubr.msk.bf16.mxu1 %vm698_vm0, %v2054_v24 }
  0x3f   : > { %851 = vmatmul.mubr.bf16.gmra.mrb[8].mxu0 %v2056_v25  ;;  %979 = vmatmul.mubr.bf16.gmra.mrb[8].mxu1 %v2057_v26 }
  0x40   : > { %1822 = vmatprep.mubr.msk.bf16.mxu0 %vm698_vm0, %v2058_v27  ;;  %1838 = vmatprep.mubr.msk.bf16.mxu1 %vm698_vm0, %v2060_v28 }
  0x47   : > { %859 = vmatmul.mubr.bf16.gmra.mrb[12].mxu0 %v2062_v29  ;;  %987 = vmatmul.mubr.bf16.gmra.mrb[12].mxu1 %v2063_v30 }
  0x48   : > { %1823 = vmatprep.mubr.msk.bf16.mxu0 %vm698_vm0, %v2064_v31  ;;  %1839 = vmatprep.mubr.msk.bf16.mxu1 %vm698_vm0, %v2066_v32 }
  0x4f   : > { %867 = vmatmul.mubr.bf16.gmra.mrb[16].mxu0 %v2068_v33  ;;  %995 = vmatmul.mubr.bf16.gmra.mrb[16].mxu1 %v2069_v34 }
  0x50   : > { %1824 = vmatprep.mubr.msk.bf16.mxu0 %vm698_vm0, %v2070_v35  ;;  %1840 = vmatprep.mubr.msk.bf16.mxu1 %vm698_vm0, %v2072_v36 }
  0x57   : > { %875 = vmatmul.mubr.bf16.gmra.mrb[20].mxu0 %v2074_v37  ;;  %1003 = vmatmul.mubr.bf16.gmra.mrb[20].mxu1 %v2075_v38 }
  0x58   : > { %1825 = vmatprep.mubr.msk.bf16.mxu0 %vm698_vm0, %v2076_v39  ;;  %1841 = vmatprep.mubr.msk.bf16.mxu1 %vm698_vm0, %v2078_v40 }
  0x5f   : > { %883 = vmatmul.mubr.bf16.gmra.mrb[24].mxu0 %v2080_v41  ;;  %1011 = vmatmul.mubr.bf16.gmra.mrb[24].mxu1 %v2081_v42 }
  0x60   : > { %1826 = vmatprep.mubr.msk.bf16.mxu0 %vm698_vm0, %v2082_v43  ;;  %1842 = vmatprep.mubr.msk.bf16.mxu1 %vm698_vm0, %v2084_v44 }
  0x67   : > { %891 = vmatmul.mubr.bf16.gmra.mrb[28].mxu0 %v2086_v45  ;;  %1019 = vmatmul.mubr.bf16.gmra.mrb[28].mxu1 %v2087_v46 }
  0x68   : > { %1827 = vmatprep.mubr.msk.bf16.mxu0 %vm698_vm0, %v2088_v47  ;;  %1843 = vmatprep.mubr.msk.bf16.mxu1 %vm698_vm0, %v2090_v48 }
  0x6f   : > { %899 = vmatmul.mubr.bf16.gmra.mrb[32].mxu0 %v2092_v49  ;;  %1027 = vmatmul.mubr.bf16.gmra.mrb[32].mxu1 %v2093_v50 }
  0x70   : > { %1828 = vmatprep.mubr.msk.bf16.mxu0 %vm698_vm0, %v2094_v51  ;;  %1844 = vmatprep.mubr.msk.bf16.mxu1 %vm698_vm0, %v2096_v52 }
  0x77   : > { %907 = vmatmul.mubr.bf16.gmra.mrb[36].mxu0 %v2098_v53  ;;  %1035 = vmatmul.mubr.bf16.gmra.mrb[36].mxu1 %v2099_v54 }
  0x78   : > { %1829 = vmatprep.mubr.msk.bf16.mxu0 %vm698_vm0, %v2100_v55  ;;  %1845 = vmatprep.mubr.msk.bf16.mxu1 %vm698_vm0, %v2102_v56 }
  0x7f   : > { %915 = vmatmul.mubr.bf16.gmra.mrb[40].mxu0 %v2104_v57  ;;  %1043 = vmatmul.mubr.bf16.gmra.mrb[40].mxu1 %v2105_v58 }
  0x80   : > { %1830 = vmatprep.mubr.msk.bf16.mxu0 %vm698_vm0, %v2106_v59  ;;  %1846 = vmatprep.mubr.msk.bf16.mxu1 %vm698_vm0, %v2108_v60 }
  0x87   : > { %923 = vmatmul.mubr.bf16.gmra.mrb[44].mxu0 %v2110_v61  ;;  %1051 = vmatmul.mubr.bf16.gmra.mrb[44].mxu1 %v2111_v62 }
  0x88   : > { %1831 = vmatprep.mubr.msk.bf16.mxu0 %vm698_vm0, %v2112_v63  ;;  %1847 = vmatprep.mubr.msk.bf16.mxu1 %vm698_vm0, %v2114_v0 }
  0x8f   : > { %931 = vmatmul.mubr.bf16.gmra.mrb[48].mxu0 %v2116_v1  ;;  %1059 = vmatmul.mubr.bf16.gmra.mrb[48].mxu1 %v2117_v2 }
  0x90   : > { %1832 = vmatprep.mubr.msk.bf16.mxu0 %vm698_vm0, %v2118_v3  ;;  %1848 = vmatprep.mubr.msk.bf16.mxu1 %vm698_vm0, %v2120_v4 }
  0x97   : > { %939 = vmatmul.mubr.bf16.gmra.mrb[52].mxu0 %v2122_v5  ;;  %1067 = vmatmul.mubr.bf16.gmra.mrb[52].mxu1 %v2123_v6 }
  0x98   : > { %1833 = vmatprep.mubr.msk.bf16.mxu0 %vm698_vm0, %v2124_v7  ;;  %1849 = vmatprep.mubr.msk.bf16.mxu1 %vm698_vm0, %v2126_v8 }
  0x9f   : > { %947 = vmatmul.mubr.bf16.gmra.mrb[56].mxu0 %v2128_v9  ;;  %1075 = vmatmul.mubr.bf16.gmra.mrb[56].mxu1 %v2129_v10 }
  0xa0   : > { %1834 = vmatprep.mubr.msk.bf16.mxu0 %vm698_vm0, %v2130_v11  ;;  %1850 = vmatprep.mubr.msk.bf16.mxu1 %vm698_vm0, %v2132_v12 }
  0xa7   : > { %955 = vmatmul.mubr.bf16.gmra.mrb[60].mxu0 %v2134_v13  ;;  %1083 = vmatmul.mubr.bf16.gmra.mrb[60].mxu1 %v2135_v14 }
 0x102   : > { %v836_v16 = vpop.f32.mrb[0].mxu0  ;;  %v964_v18 = vpop.f32.mrb[0].mxu1 }
 0x103   : > { %v1098_v19 = vmul.f32 %v2342_v15, %v836_v16  ;;  %v1130_v20 = vmul.f32 %v2342_v15, %v964_v18  ;;  %v838_v21 = vpop.f32.mrb[1].mxu0  ;;  %v966_v22 = vpop.f32.mrb[1].mxu1 }
 0x104   : > { %v839_v23 = vpop.f32.mrb[2].mxu0  ;;  %v967_v24 = vpop.f32.mrb[2].mxu1 }
 0x105   : > { %v1169_v25 = vadd.f32 %v2347_v17, %v1098_v19  ;;  %v1201_v26 = vadd.f32 %v2347_v17, %v1130_v20  ;;  %v1099_v27 = vmul.f32 %v2342_v15, %v839_v23  ;;  %v1131_v28 = vmul.f32 %v2342_v15, %v967_v24  ;;  %v841_v29 = vpop.f32.mrb[3].mxu0  ;;  %v969_v30 = vpop.f32.mrb[3].mxu1 }
 0x107   : > { %v1233_v31 = vmax.f32 %v1169_v25, 0.0  ;;  %v1265_v32 = vmax.f32 %v1201_v26, 0.0  ;;  %v1170_v33 = vadd.f32 %v2347_v17, %v1099_v27  ;;  %v1202_v34 = vadd.f32 %v2347_v17, %v1131_v28 }
 0x109   : > { %v1920_v35 = vpack.c.bf16 %v1233_v31, %v1233_v31  ;;  %v1952_v36 = vpack.c.bf16 %v1265_v32, %v1265_v32  ;;  %v1234_v37 = vmax.f32 %v1170_v33, 0.0  ;;  %v1266_v38 = vmax.f32 %v1202_v34, 0.0 }
 0x10a   : > { %v844_v39 = vpop.f32.mrb[4].mxu0  ;;  %v972_v40 = vpop.f32.mrb[4].mxu1 }
 0x10b   : > { %1554 = vst.msk [vmem:[%s2361_s25] sm:$0xf] %vm1553_vm3, %v1920_v35  ;;  %1586 = vst.msk [vmem:[%s2361_s25 + $0x80] sm:$0xf] %vm1553_vm3, %v1952_v36  ;;  %v1921_v41 = vpack.c.bf16 %v1234_v37, %v1234_v37  ;;  %v1953_v42 = vpack.c.bf16 %v1266_v38, %v1266_v38  ;;  %v1100_v43 = vmul.f32 %v2342_v15, %v844_v39  ;;  %v846_v45 = vpop.f32.mrb[5].mxu0  ;;  %v974_v46 = vpop.f32.mrb[5].mxu1 }
 0x10c   : > { %v1132_v44 = vmul.f32 %v2342_v15, %v972_v40  ;;  %v847_v47 = vpop.f32.mrb[6].mxu0  ;;  %v975_v48 = vpop.f32.mrb[6].mxu1 }
 0x10d   : > { %1555 = vst.msk [vmem:[%s2361_s25 + $0x4] sm:$0xf] %vm1553_vm3, %v1921_v41  ;;  %1587 = vst.msk [vmem:[%s2361_s25 + $0x84] sm:$0xf] %vm1553_vm3, %v1953_v42  ;;  %v1171_v49 = vadd.f32 %v2347_v17, %v1100_v43  ;;  %v1101_v51 = vmul.f32 %v2342_v15, %v847_v47  ;;  %v1133_v52 = vmul.f32 %v2342_v15, %v975_v48  ;;  %v849_v53 = vpop.f32.mrb[7].mxu0  ;;  %v977_v54 = vpop.f32.mrb[7].mxu1 }
 0x10e   : > { %v1203_v50 = vadd.f32 %v2347_v17, %v1132_v44 }
 0x10f   : > { %v1235_v55 = vmax.f32 %v1171_v49, 0.0  ;;  %v1172_v57 = vadd.f32 %v2347_v17, %v1101_v51  ;;  %v1204_v58 = vadd.f32 %v2347_v17, %v1133_v52 }
 0x110   : > { %v1267_v56 = vmax.f32 %v1203_v50, 0.0 }
 0x111   : > { %v1922_v59 = vpack.c.bf16 %v1235_v55, %v1235_v55  ;;  %v1236_v61 = vmax.f32 %v1172_v57, 0.0  ;;  %v1268_v62 = vmax.f32 %v1204_v58, 0.0 }
 0x112   : > { %v1954_v60 = vpack.c.bf16 %v1267_v56, %v1267_v56  ;;  %v852_v63 = vpop.f32.mrb[8].mxu0  ;;  %v980_v0 = vpop.f32.mrb[8].mxu1 }
 0x113   : > { %1556 = vst.msk [vmem:[%s2361_s25 + $0x8] sm:$0xf] %vm1553_vm3, %v1922_v59  ;;  %v1923_v1 = vpack.c.bf16 %v1236_v61, %v1236_v61  ;;  %v1955_v2 = vpack.c.bf16 %v1268_v62, %v1268_v62  ;;  %v1102_v3 = vmul.f32 %v2342_v15, %v852_v63  ;;  %v1134_v4 = vmul.f32 %v2342_v15, %v980_v0  ;;  %v854_v5 = vpop.f32.mrb[9].mxu0  ;;  %v982_v6 = vpop.f32.mrb[9].mxu1 }
 0x114   : > { %1588 = vst.msk [vmem:[%s2361_s25 + $0x88] sm:$0xf] %vm1553_vm3, %v1954_v60  ;;  %v855_v7 = vpop.f32.mrb[10].mxu0  ;;  %v983_v8 = vpop.f32.mrb[10].mxu1 }
 0x115   : > { %1557 = vst.msk [vmem:[%s2361_s25 + $0xc] sm:$0xf] %vm1553_vm3, %v1923_v1  ;;  %1589 = vst.msk [vmem:[%s2361_s25 + $0x8c] sm:$0xf] %vm1553_vm3, %v1955_v2  ;;  %v1173_v9 = vadd.f32 %v2347_v17, %v1102_v3  ;;  %v1205_v10 = vadd.f32 %v2347_v17, %v1134_v4  ;;  %v1103_v11 = vmul.f32 %v2342_v15, %v855_v7  ;;  %v857_v13 = vpop.f32.mrb[11].mxu0  ;;  %v985_v14 = vpop.f32.mrb[11].mxu1 }
 0x116   : > { %v1135_v12 = vmul.f32 %v2342_v15, %v983_v8 }
 0x117   : > { %v1237_v16 = vmax.f32 %v1173_v9, 0.0  ;;  %v1269_v18 = vmax.f32 %v1205_v10, 0.0  ;;  %v1174_v19 = vadd.f32 %v2347_v17, %v1103_v11 }
 0x118   : > { %v1206_v20 = vadd.f32 %v2347_v17, %v1135_v12 }
 0x119   : > { %v1924_v21 = vpack.c.bf16 %v1237_v16, %v1237_v16  ;;  %v1956_v22 = vpack.c.bf16 %v1269_v18, %v1269_v18  ;;  %v1238_v23 = vmax.f32 %v1174_v19, 0.0 }
 0x11a   : > { %v1270_v24 = vmax.f32 %v1206_v20, 0.0  ;;  %v860_v25 = vpop.f32.mrb[12].mxu0  ;;  %v988_v26 = vpop.f32.mrb[12].mxu1 }
 0x11b   : > { %1558 = vst.msk [vmem:[%s2361_s25 + $0x10] sm:$0xf] %vm1553_vm3, %v1924_v21  ;;  %1590 = vst.msk [vmem:[%s2361_s25 + $0x90] sm:$0xf] %vm1553_vm3, %v1956_v22  ;;  %v1925_v27 = vpack.c.bf16 %v1238_v23, %v1238_v23  ;;  %v1104_v29 = vmul.f32 %v2342_v15, %v860_v25  ;;  %v1136_v30 = vmul.f32 %v2342_v15, %v988_v26  ;;  %v862_v31 = vpop.f32.mrb[13].mxu0  ;;  %v990_v32 = vpop.f32.mrb[13].mxu1 }
 0x11c   : > { %v1957_v28 = vpack.c.bf16 %v1270_v24, %v1270_v24  ;;  %v863_v33 = vpop.f32.mrb[14].mxu0  ;;  %v991_v34 = vpop.f32.mrb[14].mxu1 }
 0x11d   : > { %1559 = vst.msk [vmem:[%s2361_s25 + $0x14] sm:$0xf] %vm1553_vm3, %v1925_v27  ;;  %v1175_v35 = vadd.f32 %v2347_v17, %v1104_v29  ;;  %v1207_v36 = vadd.f32 %v2347_v17, %v1136_v30  ;;  %v1105_v37 = vmul.f32 %v2342_v15, %v863_v33  ;;  %v1137_v38 = vmul.f32 %v2342_v15, %v991_v34  ;;  %v865_v39 = vpop.f32.mrb[15].mxu0  ;;  %v993_v40 = vpop.f32.mrb[15].mxu1 }
 0x11e   : > { %1591 = vst.msk [vmem:[%s2361_s25 + $0x94] sm:$0xf] %vm1553_vm3, %v1957_v28 }
 0x11f   : > { %v1239_v41 = vmax.f32 %v1175_v35, 0.0  ;;  %v1271_v42 = vmax.f32 %v1207_v36, 0.0  ;;  %v1176_v43 = vadd.f32 %v2347_v17, %v1105_v37  ;;  %v1208_v44 = vadd.f32 %v2347_v17, %v1137_v38 }
 0x121   : > { %v1926_v45 = vpack.c.bf16 %v1239_v41, %v1239_v41  ;;  %v1958_v46 = vpack.c.bf16 %v1271_v42, %v1271_v42  ;;  %v1240_v47 = vmax.f32 %v1176_v43, 0.0  ;;  %v1272_v48 = vmax.f32 %v1208_v44, 0.0 }
 0x122   : > { %v868_v49 = vpop.f32.mrb[16].mxu0  ;;  %v996_v50 = vpop.f32.mrb[16].mxu1 }
 0x123   : > { %1560 = vst.msk [vmem:[%s2361_s25 + $0x18] sm:$0xf] %vm1553_vm3, %v1926_v45  ;;  %1592 = vst.msk [vmem:[%s2361_s25 + $0x98] sm:$0xf] %vm1553_vm3, %v1958_v46  ;;  %v1927_v51 = vpack.c.bf16 %v1240_v47, %v1240_v47  ;;  %v1959_v52 = vpack.c.bf16 %v1272_v48, %v1272_v48  ;;  %v1106_v53 = vmul.f32 %v2342_v15, %v868_v49  ;;  %v870_v55 = vpop.f32.mrb[17].mxu0  ;;  %v998_v56 = vpop.f32.mrb[17].mxu1 }
 0x124   : > { %v1138_v54 = vmul.f32 %v2342_v15, %v996_v50  ;;  %v871_v57 = vpop.f32.mrb[18].mxu0  ;;  %v999_v58 = vpop.f32.mrb[18].mxu1 }
 0x125   : > { %1561 = vst.msk [vmem:[%s2361_s25 + $0x1c] sm:$0xf] %vm1553_vm3, %v1927_v51  ;;  %1593 = vst.msk [vmem:[%s2361_s25 + $0x9c] sm:$0xf] %vm1553_vm3, %v1959_v52  ;;  %v1177_v59 = vadd.f32 %v2347_v17, %v1106_v53  ;;  %v1107_v61 = vmul.f32 %v2342_v15, %v871_v57  ;;  %v1139_v62 = vmul.f32 %v2342_v15, %v999_v58  ;;  %v873_v63 = vpop.f32.mrb[19].mxu0  ;;  %v1001_v0 = vpop.f32.mrb[19].mxu1 }
 0x126   : > { %v1209_v60 = vadd.f32 %v2347_v17, %v1138_v54 }
 0x127   : > { %v1241_v1 = vmax.f32 %v1177_v59, 0.0  ;;  %v1178_v3 = vadd.f32 %v2347_v17, %v1107_v61  ;;  %v1210_v4 = vadd.f32 %v2347_v17, %v1139_v62 }
 0x128   : > { %v1273_v2 = vmax.f32 %v1209_v60, 0.0 }
 0x129   : > { %v1928_v5 = vpack.c.bf16 %v1241_v1, %v1241_v1  ;;  %v1242_v7 = vmax.f32 %v1178_v3, 0.0  ;;  %v1274_v8 = vmax.f32 %v1210_v4, 0.0 }
 0x12a   : > { %v1960_v6 = vpack.c.bf16 %v1273_v2, %v1273_v2  ;;  %v876_v9 = vpop.f32.mrb[20].mxu0  ;;  %v1004_v10 = vpop.f32.mrb[20].mxu1 }
 0x12b   : > { %1562 = vst.msk [vmem:[%s2361_s25 + $0x20] sm:$0xf] %vm1553_vm3, %v1928_v5  ;;  %v1929_v11 = vpack.c.bf16 %v1242_v7, %v1242_v7  ;;  %v1961_v12 = vpack.c.bf16 %v1274_v8, %v1274_v8  ;;  %v1108_v13 = vmul.f32 %v2342_v15, %v876_v9  ;;  %v1140_v14 = vmul.f32 %v2342_v15, %v1004_v10  ;;  %v878_v16 = vpop.f32.mrb[21].mxu0  ;;  %v1006_v18 = vpop.f32.mrb[21].mxu1 }
 0x12c   : > { %1594 = vst.msk [vmem:[%s2361_s25 + $0xa0] sm:$0xf] %vm1553_vm3, %v1960_v6  ;;  %v879_v19 = vpop.f32.mrb[22].mxu0  ;;  %v1007_v20 = vpop.f32.mrb[22].mxu1 }
 0x12d   : > { %1563 = vst.msk [vmem:[%s2361_s25 + $0x24] sm:$0xf] %vm1553_vm3, %v1929_v11  ;;  %1595 = vst.msk [vmem:[%s2361_s25 + $0xa4] sm:$0xf] %vm1553_vm3, %v1961_v12  ;;  %v1179_v21 = vadd.f32 %v2347_v17, %v1108_v13  ;;  %v1211_v22 = vadd.f32 %v2347_v17, %v1140_v14  ;;  %v1109_v23 = vmul.f32 %v2342_v15, %v879_v19  ;;  %v881_v25 = vpop.f32.mrb[23].mxu0  ;;  %v1009_v26 = vpop.f32.mrb[23].mxu1 }
 0x12e   : > { %v1141_v24 = vmul.f32 %v2342_v15, %v1007_v20 }
 0x12f   : > { %v1243_v27 = vmax.f32 %v1179_v21, 0.0  ;;  %v1275_v28 = vmax.f32 %v1211_v22, 0.0  ;;  %v1180_v29 = vadd.f32 %v2347_v17, %v1109_v23 }
 0x130   : > { %v1212_v30 = vadd.f32 %v2347_v17, %v1141_v24 }
 0x131   : > { %v1930_v31 = vpack.c.bf16 %v1243_v27, %v1243_v27  ;;  %v1962_v32 = vpack.c.bf16 %v1275_v28, %v1275_v28  ;;  %v1244_v33 = vmax.f32 %v1180_v29, 0.0 }
 0x132   : > { %v1276_v34 = vmax.f32 %v1212_v30, 0.0  ;;  %v884_v35 = vpop.f32.mrb[24].mxu0  ;;  %v1012_v36 = vpop.f32.mrb[24].mxu1 }
 0x133   : > { %1564 = vst.msk [vmem:[%s2361_s25 + $0x28] sm:$0xf] %vm1553_vm3, %v1930_v31  ;;  %1596 = vst.msk [vmem:[%s2361_s25 + $0xa8] sm:$0xf] %vm1553_vm3, %v1962_v32  ;;  %v1931_v37 = vpack.c.bf16 %v1244_v33, %v1244_v33  ;;  %v1110_v39 = vmul.f32 %v2342_v15, %v884_v35  ;;  %v1142_v40 = vmul.f32 %v2342_v15, %v1012_v36  ;;  %v886_v41 = vpop.f32.mrb[25].mxu0  ;;  %v1014_v42 = vpop.f32.mrb[25].mxu1 }
 0x134   : > { %v1963_v38 = vpack.c.bf16 %v1276_v34, %v1276_v34  ;;  %v887_v43 = vpop.f32.mrb[26].mxu0  ;;  %v1015_v44 = vpop.f32.mrb[26].mxu1 }
 0x135   : > { %1565 = vst.msk [vmem:[%s2361_s25 + $0x2c] sm:$0xf] %vm1553_vm3, %v1931_v37  ;;  %v1181_v45 = vadd.f32 %v2347_v17, %v1110_v39  ;;  %v1213_v46 = vadd.f32 %v2347_v17, %v1142_v40  ;;  %v1111_v47 = vmul.f32 %v2342_v15, %v887_v43  ;;  %v1143_v48 = vmul.f32 %v2342_v15, %v1015_v44  ;;  %v889_v49 = vpop.f32.mrb[27].mxu0  ;;  %v1017_v50 = vpop.f32.mrb[27].mxu1 }
 0x136   : > { %1597 = vst.msk [vmem:[%s2361_s25 + $0xac] sm:$0xf] %vm1553_vm3, %v1963_v38 }
 0x137   : > { %v1245_v51 = vmax.f32 %v1181_v45, 0.0  ;;  %v1277_v52 = vmax.f32 %v1213_v46, 0.0  ;;  %v1182_v53 = vadd.f32 %v2347_v17, %v1111_v47  ;;  %v1214_v54 = vadd.f32 %v2347_v17, %v1143_v48 }
 0x139   : > { %v1932_v55 = vpack.c.bf16 %v1245_v51, %v1245_v51  ;;  %v1964_v56 = vpack.c.bf16 %v1277_v52, %v1277_v52  ;;  %v1246_v57 = vmax.f32 %v1182_v53, 0.0  ;;  %v1278_v58 = vmax.f32 %v1214_v54, 0.0 }
 0x13a   : > { %v892_v59 = vpop.f32.mrb[28].mxu0  ;;  %v1020_v60 = vpop.f32.mrb[28].mxu1 }
 0x13b   : > { %1566 = vst.msk [vmem:[%s2361_s25 + $0x30] sm:$0xf] %vm1553_vm3, %v1932_v55  ;;  %1598 = vst.msk [vmem:[%s2361_s25 + $0xb0] sm:$0xf] %vm1553_vm3, %v1964_v56  ;;  %v1933_v61 = vpack.c.bf16 %v1246_v57, %v1246_v57  ;;  %v1965_v62 = vpack.c.bf16 %v1278_v58, %v1278_v58  ;;  %v1112_v63 = vmul.f32 %v2342_v15, %v892_v59  ;;  %v894_v1 = vpop.f32.mrb[29].mxu0  ;;  %v1022_v2 = vpop.f32.mrb[29].mxu1 }
 0x13c   : > { %v1144_v0 = vmul.f32 %v2342_v15, %v1020_v60  ;;  %v895_v3 = vpop.f32.mrb[30].mxu0  ;;  %v1023_v4 = vpop.f32.mrb[30].mxu1 }
 0x13d   : > { %1567 = vst.msk [vmem:[%s2361_s25 + $0x34] sm:$0xf] %vm1553_vm3, %v1933_v61  ;;  %1599 = vst.msk [vmem:[%s2361_s25 + $0xb4] sm:$0xf] %vm1553_vm3, %v1965_v62  ;;  %v1183_v5 = vadd.f32 %v2347_v17, %v1112_v63  ;;  %v1113_v7 = vmul.f32 %v2342_v15, %v895_v3  ;;  %v1145_v8 = vmul.f32 %v2342_v15, %v1023_v4  ;;  %v897_v9 = vpop.f32.mrb[31].mxu0  ;;  %v1025_v10 = vpop.f32.mrb[31].mxu1 }
 0x13e   : > { %v1215_v6 = vadd.f32 %v2347_v17, %v1144_v0 }
 0x13f   : > { %v1247_v11 = vmax.f32 %v1183_v5, 0.0  ;;  %v1184_v13 = vadd.f32 %v2347_v17, %v1113_v7  ;;  %v1216_v14 = vadd.f32 %v2347_v17, %v1145_v8 }
 0x140   : > { %v1279_v12 = vmax.f32 %v1215_v6, 0.0 }
 0x141   : > { %v1934_v16 = vpack.c.bf16 %v1247_v11, %v1247_v11  ;;  %v1248_v19 = vmax.f32 %v1184_v13, 0.0  ;;  %v1280_v20 = vmax.f32 %v1216_v14, 0.0 }
 0x142   : > { %v1966_v18 = vpack.c.bf16 %v1279_v12, %v1279_v12  ;;  %v900_v21 = vpop.f32.mrb[32].mxu0  ;;  %v1028_v22 = vpop.f32.mrb[32].mxu1 }
 0x143   : > { %1568 = vst.msk [vmem:[%s2361_s25 + $0x38] sm:$0xf] %vm1553_vm3, %v1934_v16  ;;  %v1935_v23 = vpack.c.bf16 %v1248_v19, %v1248_v19  ;;  %v1967_v24 = vpack.c.bf16 %v1280_v20, %v1280_v20  ;;  %v1114_v25 = vmul.f32 %v2342_v15, %v900_v21  ;;  %v1146_v26 = vmul.f32 %v2342_v15, %v1028_v22  ;;  %v902_v27 = vpop.f32.mrb[33].mxu0  ;;  %v1030_v28 = vpop.f32.mrb[33].mxu1 }
 0x144   : > { %1600 = vst.msk [vmem:[%s2361_s25 + $0xb8] sm:$0xf] %vm1553_vm3, %v1966_v18  ;;  %v903_v29 = vpop.f32.mrb[34].mxu0  ;;  %v1031_v30 = vpop.f32.mrb[34].mxu1 }
 0x145   : > { %1569 = vst.msk [vmem:[%s2361_s25 + $0x3c] sm:$0xf] %vm1553_vm3, %v1935_v23  ;;  %1601 = vst.msk [vmem:[%s2361_s25 + $0xbc] sm:$0xf] %vm1553_vm3, %v1967_v24  ;;  %v1185_v31 = vadd.f32 %v2347_v17, %v1114_v25  ;;  %v1217_v32 = vadd.f32 %v2347_v17, %v1146_v26  ;;  %v1115_v33 = vmul.f32 %v2342_v15, %v903_v29  ;;  %v905_v35 = vpop.f32.mrb[35].mxu0  ;;  %v1033_v36 = vpop.f32.mrb[35].mxu1 }
 0x146   : > { %v1147_v34 = vmul.f32 %v2342_v15, %v1031_v30 }
 0x147   : > { %v1249_v37 = vmax.f32 %v1185_v31, 0.0  ;;  %v1281_v38 = vmax.f32 %v1217_v32, 0.0  ;;  %v1186_v39 = vadd.f32 %v2347_v17, %v1115_v33 }
 0x148   : > { %v1218_v40 = vadd.f32 %v2347_v17, %v1147_v34 }
 0x149   : > { %v1936_v41 = vpack.c.bf16 %v1249_v37, %v1249_v37  ;;  %v1968_v42 = vpack.c.bf16 %v1281_v38, %v1281_v38  ;;  %v1250_v43 = vmax.f32 %v1186_v39, 0.0 }
 0x14a   : > { %v1282_v44 = vmax.f32 %v1218_v40, 0.0  ;;  %v908_v45 = vpop.f32.mrb[36].mxu0  ;;  %v1036_v46 = vpop.f32.mrb[36].mxu1 }
 0x14b   : > { %1570 = vst.msk [vmem:[%s2361_s25 + $0x40] sm:$0xf] %vm1553_vm3, %v1936_v41  ;;  %1602 = vst.msk [vmem:[%s2361_s25 + $0xc0] sm:$0xf] %vm1553_vm3, %v1968_v42  ;;  %v1937_v47 = vpack.c.bf16 %v1250_v43, %v1250_v43  ;;  %v1116_v49 = vmul.f32 %v2342_v15, %v908_v45  ;;  %v1148_v50 = vmul.f32 %v2342_v15, %v1036_v46  ;;  %v910_v51 = vpop.f32.mrb[37].mxu0  ;;  %v1038_v52 = vpop.f32.mrb[37].mxu1 }
 0x14c   : > { %v1969_v48 = vpack.c.bf16 %v1282_v44, %v1282_v44  ;;  %v911_v53 = vpop.f32.mrb[38].mxu0  ;;  %v1039_v54 = vpop.f32.mrb[38].mxu1 }
 0x14d   : > { %1571 = vst.msk [vmem:[%s2361_s25 + $0x44] sm:$0xf] %vm1553_vm3, %v1937_v47  ;;  %v1187_v55 = vadd.f32 %v2347_v17, %v1116_v49  ;;  %v1219_v56 = vadd.f32 %v2347_v17, %v1148_v50  ;;  %v1117_v57 = vmul.f32 %v2342_v15, %v911_v53  ;;  %v1149_v58 = vmul.f32 %v2342_v15, %v1039_v54  ;;  %v913_v59 = vpop.f32.mrb[39].mxu0  ;;  %v1041_v60 = vpop.f32.mrb[39].mxu1 }
 0x14e   : > { %1603 = vst.msk [vmem:[%s2361_s25 + $0xc4] sm:$0xf] %vm1553_vm3, %v1969_v48 }
 0x14f   : > { %v1251_v61 = vmax.f32 %v1187_v55, 0.0  ;;  %v1283_v62 = vmax.f32 %v1219_v56, 0.0  ;;  %v1188_v63 = vadd.f32 %v2347_v17, %v1117_v57  ;;  %v1220_v0 = vadd.f32 %v2347_v17, %v1149_v58 }
 0x151   : > { %v1938_v1 = vpack.c.bf16 %v1251_v61, %v1251_v61  ;;  %v1970_v2 = vpack.c.bf16 %v1283_v62, %v1283_v62  ;;  %v1252_v3 = vmax.f32 %v1188_v63, 0.0  ;;  %v1284_v4 = vmax.f32 %v1220_v0, 0.0 }
 0x152   : > { %v916_v5 = vpop.f32.mrb[40].mxu0  ;;  %v1044_v6 = vpop.f32.mrb[40].mxu1 }
 0x153   : > { %1572 = vst.msk [vmem:[%s2361_s25 + $0x48] sm:$0xf] %vm1553_vm3, %v1938_v1  ;;  %1604 = vst.msk [vmem:[%s2361_s25 + $0xc8] sm:$0xf] %vm1553_vm3, %v1970_v2  ;;  %v1939_v7 = vpack.c.bf16 %v1252_v3, %v1252_v3  ;;  %v1971_v8 = vpack.c.bf16 %v1284_v4, %v1284_v4  ;;  %v1118_v9 = vmul.f32 %v2342_v15, %v916_v5  ;;  %v918_v11 = vpop.f32.mrb[41].mxu0  ;;  %v1046_v12 = vpop.f32.mrb[41].mxu1 }
 0x154   : > { %v1150_v10 = vmul.f32 %v2342_v15, %v1044_v6  ;;  %v919_v13 = vpop.f32.mrb[42].mxu0  ;;  %v1047_v14 = vpop.f32.mrb[42].mxu1 }
 0x155   : > { %1573 = vst.msk [vmem:[%s2361_s25 + $0x4c] sm:$0xf] %vm1553_vm3, %v1939_v7  ;;  %1605 = vst.msk [vmem:[%s2361_s25 + $0xcc] sm:$0xf] %vm1553_vm3, %v1971_v8  ;;  %v1189_v16 = vadd.f32 %v2347_v17, %v1118_v9  ;;  %v1119_v19 = vmul.f32 %v2342_v15, %v919_v13  ;;  %v1151_v20 = vmul.f32 %v2342_v15, %v1047_v14  ;;  %v921_v21 = vpop.f32.mrb[43].mxu0  ;;  %v1049_v22 = vpop.f32.mrb[43].mxu1 }
 0x156   : > { %v1221_v18 = vadd.f32 %v2347_v17, %v1150_v10 }
 0x157   : > { %v1253_v23 = vmax.f32 %v1189_v16, 0.0  ;;  %v1190_v25 = vadd.f32 %v2347_v17, %v1119_v19  ;;  %v1222_v26 = vadd.f32 %v2347_v17, %v1151_v20 }
 0x158   : > { %v1285_v24 = vmax.f32 %v1221_v18, 0.0 }
 0x159   : > { %v1940_v27 = vpack.c.bf16 %v1253_v23, %v1253_v23  ;;  %v1254_v29 = vmax.f32 %v1190_v25, 0.0  ;;  %v1286_v30 = vmax.f32 %v1222_v26, 0.0 }
 0x15a   : > { %v1972_v28 = vpack.c.bf16 %v1285_v24, %v1285_v24  ;;  %v924_v31 = vpop.f32.mrb[44].mxu0  ;;  %v1052_v32 = vpop.f32.mrb[44].mxu1 }
 0x15b   : > { %1574 = vst.msk [vmem:[%s2361_s25 + $0x50] sm:$0xf] %vm1553_vm3, %v1940_v27  ;;  %v1941_v33 = vpack.c.bf16 %v1254_v29, %v1254_v29  ;;  %v1973_v34 = vpack.c.bf16 %v1286_v30, %v1286_v30  ;;  %v1120_v35 = vmul.f32 %v2342_v15, %v924_v31  ;;  %v1152_v36 = vmul.f32 %v2342_v15, %v1052_v32  ;;  %v926_v37 = vpop.f32.mrb[45].mxu0  ;;  %v1054_v38 = vpop.f32.mrb[45].mxu1 }
 0x15c   : > { %1606 = vst.msk [vmem:[%s2361_s25 + $0xd0] sm:$0xf] %vm1553_vm3, %v1972_v28  ;;  %v927_v39 = vpop.f32.mrb[46].mxu0  ;;  %v1055_v40 = vpop.f32.mrb[46].mxu1 }
 0x15d   : > { %1575 = vst.msk [vmem:[%s2361_s25 + $0x54] sm:$0xf] %vm1553_vm3, %v1941_v33  ;;  %1607 = vst.msk [vmem:[%s2361_s25 + $0xd4] sm:$0xf] %vm1553_vm3, %v1973_v34  ;;  %v1191_v41 = vadd.f32 %v2347_v17, %v1120_v35  ;;  %v1223_v42 = vadd.f32 %v2347_v17, %v1152_v36  ;;  %v1121_v43 = vmul.f32 %v2342_v15, %v927_v39  ;;  %v929_v45 = vpop.f32.mrb[47].mxu0  ;;  %v1057_v46 = vpop.f32.mrb[47].mxu1 }
 0x15e   : > { %v1153_v44 = vmul.f32 %v2342_v15, %v1055_v40 }
 0x15f   : > { %v1255_v47 = vmax.f32 %v1191_v41, 0.0  ;;  %v1287_v48 = vmax.f32 %v1223_v42, 0.0  ;;  %v1192_v49 = vadd.f32 %v2347_v17, %v1121_v43 }
 0x160   : > { %v1224_v50 = vadd.f32 %v2347_v17, %v1153_v44 }
 0x161   : > { %v1942_v51 = vpack.c.bf16 %v1255_v47, %v1255_v47  ;;  %v1974_v52 = vpack.c.bf16 %v1287_v48, %v1287_v48  ;;  %v1256_v53 = vmax.f32 %v1192_v49, 0.0 }
 0x162   : > { %v1288_v54 = vmax.f32 %v1224_v50, 0.0  ;;  %v932_v55 = vpop.f32.mrb[48].mxu0  ;;  %v1060_v56 = vpop.f32.mrb[48].mxu1 }
 0x163   : > { %1576 = vst.msk [vmem:[%s2361_s25 + $0x58] sm:$0xf] %vm1553_vm3, %v1942_v51  ;;  %1608 = vst.msk [vmem:[%s2361_s25 + $0xd8] sm:$0xf] %vm1553_vm3, %v1974_v52  ;;  %v1943_v57 = vpack.c.bf16 %v1256_v53, %v1256_v53  ;;  %v1122_v59 = vmul.f32 %v2342_v15, %v932_v55  ;;  %v1154_v60 = vmul.f32 %v2342_v15, %v1060_v56  ;;  %v934_v61 = vpop.f32.mrb[49].mxu0  ;;  %v1062_v62 = vpop.f32.mrb[49].mxu1 }
 0x164   : > { %v1975_v58 = vpack.c.bf16 %v1288_v54, %v1288_v54  ;;  %v935_v63 = vpop.f32.mrb[50].mxu0  ;;  %v1063_v0 = vpop.f32.mrb[50].mxu1 }
 0x165   : > { %1577 = vst.msk [vmem:[%s2361_s25 + $0x5c] sm:$0xf] %vm1553_vm3, %v1943_v57  ;;  %v1193_v1 = vadd.f32 %v2347_v17, %v1122_v59  ;;  %v1225_v2 = vadd.f32 %v2347_v17, %v1154_v60  ;;  %v1123_v3 = vmul.f32 %v2342_v15, %v935_v63  ;;  %v1155_v4 = vmul.f32 %v2342_v15, %v1063_v0  ;;  %v937_v5 = vpop.f32.mrb[51].mxu0  ;;  %v1065_v6 = vpop.f32.mrb[51].mxu1 }
 0x166   : > { %1609 = vst.msk [vmem:[%s2361_s25 + $0xdc] sm:$0xf] %vm1553_vm3, %v1975_v58 }
 0x167   : > { %v1257_v7 = vmax.f32 %v1193_v1, 0.0  ;;  %v1289_v8 = vmax.f32 %v1225_v2, 0.0  ;;  %v1194_v9 = vadd.f32 %v2347_v17, %v1123_v3  ;;  %v1226_v10 = vadd.f32 %v2347_v17, %v1155_v4 }
 0x169   : > { %v1944_v11 = vpack.c.bf16 %v1257_v7, %v1257_v7  ;;  %v1976_v12 = vpack.c.bf16 %v1289_v8, %v1289_v8  ;;  %v1258_v13 = vmax.f32 %v1194_v9, 0.0  ;;  %v1290_v14 = vmax.f32 %v1226_v10, 0.0 }
 0x16a   : > { %v940_v16 = vpop.f32.mrb[52].mxu0  ;;  %v1068_v18 = vpop.f32.mrb[52].mxu1 }
 0x16b   : > { %1578 = vst.msk [vmem:[%s2361_s25 + $0x60] sm:$0xf] %vm1553_vm3, %v1944_v11  ;;  %1610 = vst.msk [vmem:[%s2361_s25 + $0xe0] sm:$0xf] %vm1553_vm3, %v1976_v12  ;;  %v1945_v19 = vpack.c.bf16 %v1258_v13, %v1258_v13  ;;  %v1977_v20 = vpack.c.bf16 %v1290_v14, %v1290_v14  ;;  %v1124_v21 = vmul.f32 %v2342_v15, %v940_v16  ;;  %v942_v23 = vpop.f32.mrb[53].mxu0  ;;  %v1070_v24 = vpop.f32.mrb[53].mxu1 }
 0x16c   : > { %v1156_v22 = vmul.f32 %v2342_v15, %v1068_v18  ;;  %v943_v25 = vpop.f32.mrb[54].mxu0  ;;  %v1071_v26 = vpop.f32.mrb[54].mxu1 }
 0x16d   : > { %1579 = vst.msk [vmem:[%s2361_s25 + $0x64] sm:$0xf] %vm1553_vm3, %v1945_v19  ;;  %1611 = vst.msk [vmem:[%s2361_s25 + $0xe4] sm:$0xf] %vm1553_vm3, %v1977_v20  ;;  %v1195_v27 = vadd.f32 %v2347_v17, %v1124_v21  ;;  %v1125_v29 = vmul.f32 %v2342_v15, %v943_v25  ;;  %v1157_v30 = vmul.f32 %v2342_v15, %v1071_v26  ;;  %v945_v31 = vpop.f32.mrb[55].mxu0  ;;  %v1073_v32 = vpop.f32.mrb[55].mxu1 }
 0x16e   : > { %v1227_v28 = vadd.f32 %v2347_v17, %v1156_v22 }
 0x16f   : > { %v1259_v33 = vmax.f32 %v1195_v27, 0.0  ;;  %v1196_v35 = vadd.f32 %v2347_v17, %v1125_v29  ;;  %v1228_v36 = vadd.f32 %v2347_v17, %v1157_v30 }
 0x170   : > { %v1291_v34 = vmax.f32 %v1227_v28, 0.0 }
 0x171   : > { %v1946_v37 = vpack.c.bf16 %v1259_v33, %v1259_v33  ;;  %v1260_v39 = vmax.f32 %v1196_v35, 0.0  ;;  %v1292_v40 = vmax.f32 %v1228_v36, 0.0 }
 0x172   : > { %v1978_v38 = vpack.c.bf16 %v1291_v34, %v1291_v34  ;;  %v948_v41 = vpop.f32.mrb[56].mxu0  ;;  %v1076_v42 = vpop.f32.mrb[56].mxu1 }
 0x173   : > { %1580 = vst.msk [vmem:[%s2361_s25 + $0x68] sm:$0xf] %vm1553_vm3, %v1946_v37  ;;  %v1947_v43 = vpack.c.bf16 %v1260_v39, %v1260_v39  ;;  %v1979_v44 = vpack.c.bf16 %v1292_v40, %v1292_v40  ;;  %v1126_v45 = vmul.f32 %v2342_v15, %v948_v41  ;;  %v1158_v46 = vmul.f32 %v2342_v15, %v1076_v42  ;;  %v950_v47 = vpop.f32.mrb[57].mxu0  ;;  %v1078_v48 = vpop.f32.mrb[57].mxu1 }
 0x174   : > { %1612 = vst.msk [vmem:[%s2361_s25 + $0xe8] sm:$0xf] %vm1553_vm3, %v1978_v38  ;;  %v951_v49 = vpop.f32.mrb[58].mxu0  ;;  %v1079_v50 = vpop.f32.mrb[58].mxu1 }
 0x175   : > { %1581 = vst.msk [vmem:[%s2361_s25 + $0x6c] sm:$0xf] %vm1553_vm3, %v1947_v43  ;;  %1613 = vst.msk [vmem:[%s2361_s25 + $0xec] sm:$0xf] %vm1553_vm3, %v1979_v44  ;;  %v1197_v51 = vadd.f32 %v2347_v17, %v1126_v45  ;;  %v1229_v52 = vadd.f32 %v2347_v17, %v1158_v46  ;;  %v1127_v53 = vmul.f32 %v2342_v15, %v951_v49  ;;  %v953_v55 = vpop.f32.mrb[59].mxu0  ;;  %v1081_v56 = vpop.f32.mrb[59].mxu1 }
 0x176   : > { %v1159_v54 = vmul.f32 %v2342_v15, %v1079_v50 }
 0x177   : > { %v1261_v57 = vmax.f32 %v1197_v51, 0.0  ;;  %v1293_v58 = vmax.f32 %v1229_v52, 0.0  ;;  %v1198_v59 = vadd.f32 %v2347_v17, %v1127_v53 }
 0x178   : > { %v1230_v60 = vadd.f32 %v2347_v17, %v1159_v54 }
 0x179   : > { %v1948_v61 = vpack.c.bf16 %v1261_v57, %v1261_v57  ;;  %v1980_v62 = vpack.c.bf16 %v1293_v58, %v1293_v58  ;;  %v1262_v63 = vmax.f32 %v1198_v59, 0.0 }
 0x17a   : > { %v1294_v0 = vmax.f32 %v1230_v60, 0.0  ;;  %v956_v1 = vpop.f32.mrb[60].mxu0  ;;  %v1084_v2 = vpop.f32.mrb[60].mxu1 }
 0x17b   : > { %1582 = vst.msk [vmem:[%s2361_s25 + $0x70] sm:$0xf] %vm1553_vm3, %v1948_v61  ;;  %1614 = vst.msk [vmem:[%s2361_s25 + $0xf0] sm:$0xf] %vm1553_vm3, %v1980_v62  ;;  %v1949_v3 = vpack.c.bf16 %v1262_v63, %v1262_v63  ;;  %v1128_v5 = vmul.f32 %v2342_v15, %v956_v1  ;;  %v1160_v6 = vmul.f32 %v2342_v15, %v1084_v2  ;;  %v958_v7 = vpop.f32.mrb[61].mxu0  ;;  %v1086_v8 = vpop.f32.mrb[61].mxu1 }
 0x17c   : > { %v1981_v4 = vpack.c.bf16 %v1294_v0, %v1294_v0  ;;  %v959_v9 = vpop.f32.mrb[62].mxu0  ;;  %v1087_v10 = vpop.f32.mrb[62].mxu1 }
 0x17d   : > { %1583 = vst.msk [vmem:[%s2361_s25 + $0x74] sm:$0xf] %vm1553_vm3, %v1949_v3  ;;  %v1199_v11 = vadd.f32 %v2347_v17, %v1128_v5  ;;  %v1231_v12 = vadd.f32 %v2347_v17, %v1160_v6  ;;  %v1129_v13 = vmul.f32 %v2342_v15, %v959_v9  ;;  %v1161_v14 = vmul.f32 %v2342_v15, %v1087_v10  ;;  %v961_v16 = vpop.f32.mrb[63].mxu0  ;;  %v1089_v18 = vpop.f32.mrb[63].mxu1 }
 0x17e   : > { %1615 = vst.msk [vmem:[%s2361_s25 + $0xf4] sm:$0xf] %vm1553_vm3, %v1981_v4 }
 0x17f   : > { %v1263_v19 = vmax.f32 %v1199_v11, 0.0  ;;  %v1295_v20 = vmax.f32 %v1231_v12, 0.0  ;;  %v1200_v21 = vadd.f32 %v2347_v17, %v1129_v13  ;;  %v1232_v22 = vadd.f32 %v2347_v17, %v1161_v14 }
 0x181   : > { %v1950_v23 = vpack.c.bf16 %v1263_v19, %v1263_v19  ;;  %v1982_v24 = vpack.c.bf16 %v1295_v20, %v1295_v20  ;;  %v1264_v25 = vmax.f32 %v1200_v21, 0.0  ;;  %v1296_v26 = vmax.f32 %v1232_v22, 0.0 }
 0x183   : > { %1584 = vst.msk [vmem:[%s2361_s25 + $0x78] sm:$0xf] %vm1553_vm3, %v1950_v23  ;;  %1616 = vst.msk [vmem:[%s2361_s25 + $0xf8] sm:$0xf] %vm1553_vm3, %v1982_v24  ;;  %v1951_v27 = vpack.c.bf16 %v1264_v25, %v1264_v25  ;;  %v1983_v28 = vpack.c.bf16 %v1296_v26, %v1296_v26 }
 0x185   : > { %1585 = vst.msk [vmem:[%s2361_s25 + $0x7c] sm:$0xf] %vm1553_vm3, %v1951_v27  ;;  %1617 = vst.msk [vmem:[%s2361_s25 + $0xfc] sm:$0xf] %vm1553_vm3, %v1983_v28 }
 0x186 PF: > { %s14_s17 = sadd.s32 1, %s2158_s17   ;;  %s2625_s15 = smov %s2154_s16 }
 0x187   : > { %p11_p5 = scmp.ge.s32.totalorder %s14_s17, 10   ;;  %s2626_s16 = smov %s2628_s18 }
 0x189   :  { %13 = sbr.rel (!%p11_p5) target bundleno = 2 (0x2), region = 75 }

</bundles_post_ra>
